<compile_context>
chip_gen: v5e
topology: v5e:2x2
jax: 0.10.0
libtpu: 0.0.40
codegen_flags: <defaults>
</compile_context>

<pallas_src>
import jax
import jax.numpy as jnp
import numpy as np
from jax.experimental import pallas as pl
from jax.experimental.pallas import tpu as pltpu


def encoder_kernel(x_ref, w1_ref, b1_ref, w2_ref, b2_ref, sel_ref, wp_ref,
                   bp_ref, o_ref, cat_ref):
    """One grid step: `nb` packed (sample, time) rows through the encoder.

    x_ref:   (1, rows, 3*Cin) bf16 im2col'd conv1 input; first rows/2 rows are
             the even time steps of every sample, last rows/2 the odd ones.
    w1_ref:  (3*Cin, C1) bf16    b1_ref: (1, C1) f32
    w2_ref:  (3*C1, C2) bf16     b2_ref: (1, C2) f32
    sel_ref: (nb, rows/2) bf16 fused pool2 + temporal-sum selector
    wp_ref:  (C2, hidden) bf16 (pre-scaled by 1/pooled_len)  bp_ref: (1,hidden) f32
    o_ref:   (1, nb, hidden) f32
    cat_ref: (rows/2, 3*C1) f32 VMEM scratch — conv2 im2col staging.
    """
    rows = x_ref.shape[1]
    nb = o_ref.shape[1]
    c1 = w1_ref.shape[1]
    rows2 = rows // 2
    t2 = rows2 // nb                     # pooled time steps per sample

    # ---- conv1 (k=3, pad=1) as ONE matmul (taps fused by wrapper im2col) ----
    y1 = jnp.dot(x_ref[0], w1_ref[...],
                 preferred_element_type=jnp.float32) + b1_ref[...]
    y1 = jnp.maximum(y1, 0.0)                                   # (rows, C1) f32

    # ---- maxpool1d(2): parity-split layout -> static-slice pairwise max ----
    p1 = jnp.maximum(y1[:rows2], y1[rows2:])                    # (rows2, C1)

    # ---- conv2 (k=3, pad=1): in-kernel im2col into VMEM, ONE matmul ----
    # Sample boundaries inside the packed tile see the conv zero padding.
    pos = jax.lax.broadcasted_iota(jnp.int32, (rows2, 1), 0) % t2
    prev = jnp.where(pos == 0, 0.0, pltpu.roll(p1, shift=1, axis=0))
    nxt = jnp.where(pos == t2 - 1, 0.0,
                    pltpu.roll(p1, shift=rows2 - 1, axis=0))
    cat_ref[:, 0:c1] = prev
    cat_ref[:, c1:2 * c1] = p1
    cat_ref[:, 2 * c1:3 * c1] = nxt
    y2 = jnp.dot(cat_ref[...].astype(w2_ref.dtype), w2_ref[...],
                 preferred_element_type=jnp.float32) + b2_ref[...]
    y2 = jnp.maximum(y2, 0.0)                                   # (rows2, C2) f32

    # ---- maxpool1d(2) + temporal mean fused into one small selection matmul ----
    # z2 at even pooled-time rows holds the pool-2 pairwise max; the selector
    # reads only those rows (t2 is even, so the roll wrap-around row is odd
    # and never selected).  The 1/pooled_len factor is folded into wp.
    z2 = jnp.maximum(y2, pltpu.roll(y2, shift=rows2 - 1, axis=0))
    m = jnp.dot(sel_ref[...], z2.astype(sel_ref.dtype),
                preferred_element_type=jnp.float32)             # (nb, C2) f32

    # ---- output projection ----
    o = jnp.dot(m.astype(wp_ref.dtype), wp_ref[...],
                preferred_element_type=jnp.float32) + bp_ref[...]
    o_ref[0] = o                                                # (nb, hidden)


def _pick_samples_per_block(n, t, target_rows=256):
    """Pack samples so each matmul has a dense M (~target_rows rows).  On
    single-TC v5e/v6e this usually yields grid=1 (no serial per-step
    overhead); on dual-TC v7x pass `samples_per_block` explicitly to keep
    >= 2 'parallel' grid steps."""
    nb = max(1, min(n, max(1, target_rows // t)))
    while n % nb:                        # keep index maps / shapes simple
        nb -= 1
    return nb


def audio_encoder(x, params, samples_per_block=None):
    """x: (B, S, C_in, T) f32.  params in PyTorch layouts:
       conv1 (C1, C_in, 3), (C1,); conv2 (C2, C1, 3), (C2,);
       linear (hidden, C2), (hidden,).  Returns (B, S, hidden) f32."""
    w1, b1, w2, b2, wp, bp = params
    B, S, C_in, T = x.shape
    N = B * S
    c1, c2, hidden = w1.shape[0], w2.shape[0], wp.shape[0]
    assert T % 4 == 0, "two maxpool1d(2) stages need T % 4 == 0"
    t2, t4 = T // 2, T // 4

    nb = (samples_per_block if samples_per_block is not None
          else _pick_samples_per_block(N, T))
    assert N % nb == 0
    grid = N // nb
    rows, rows2 = nb * T, nb * T // 2

    # ---- input prep (one cheap XLA pass over a small input) ----
    # (B,S,Cin,T) -> (N,T,Cin); im2col the k=3 taps onto the channel axis so
    # conv1 is one matmul with exact zero padding; parity-split each block's
    # rows into [even time steps ; odd time steps] so pool1 is a static-slice
    # max; feed the MXU bf16 (halves input DMA bytes).
    # TODO(synk): for large N*T do the transpose/im2col in-kernel to avoid
    # this extra HBM pass over the input.
    xt = x.reshape(N, C_in, T).transpose(0, 2, 1)               # (N, T, Cin)
    xp = jnp.pad(xt, ((0, 0), (1, 1), (0, 0)))
    x_cat = jnp.concatenate([xp[:, :-2], xp[:, 1:-1], xp[:, 2:]], axis=-1)
    xb = x_cat.reshape(grid, nb, T, 3 * C_in)
    x_rows = jnp.concatenate(
        [xb[:, :, 0::2].reshape(grid, rows2, 3 * C_in),
         xb[:, :, 1::2].reshape(grid, rows2, 3 * C_in)],
        axis=1).astype(jnp.bfloat16)                            # (grid, rows, 3Cin)

    # ---- weights: PyTorch layouts -> (K, Cout) bf16; biases stay f32 ----
    w1m = jnp.transpose(w1, (2, 1, 0)).reshape(3 * C_in, c1).astype(jnp.bfloat16)
    w2m = jnp.transpose(w2, (2, 1, 0)).reshape(3 * c1, c2).astype(jnp.bfloat16)
    wpm = (jnp.transpose(wp) / t4).astype(jnp.bfloat16)         # mean folded in
    b1f = b1.reshape(1, c1).astype(jnp.float32)
    b2f = b2.reshape(1, c2).astype(jnp.float32)
    bpf = bp.reshape(1, hidden).astype(jnp.float32)

    # Fused pool2 + temporal-sum selector: 0/1 entries (exact in bf16),
    # precomputed once on the host, VMEM-resident via a constant index_map.
    r = jnp.arange(rows2)
    sel = ((r[None, :] // t2 == jnp.arange(nb)[:, None])
           & (r[None, :] % t2 % 2 == 0)).astype(jnp.bfloat16)   # (nb, rows2)

    out = pl.pallas_call(
        encoder_kernel,
        out_shape=jax.ShapeDtypeStruct((grid, nb, hidden), jnp.float32),
        grid_spec=pltpu.PrefetchScalarGridSpec(
            num_scalar_prefetch=0,
            grid=(grid,),
            in_specs=[
                pl.BlockSpec((1, rows, 3 * C_in), lambda g: (g, 0, 0)),
                # Constant index_maps: weights/selector stay VMEM-resident.
                pl.BlockSpec((3 * C_in, c1), lambda g: (0, 0)),
                pl.BlockSpec((1, c1), lambda g: (0, 0)),
                pl.BlockSpec((3 * c1, c2), lambda g: (0, 0)),
                pl.BlockSpec((1, c2), lambda g: (0, 0)),
                pl.BlockSpec((nb, rows2), lambda g: (0, 0)),
                pl.BlockSpec((c2, hidden), lambda g: (0, 0)),
                pl.BlockSpec((1, hidden), lambda g: (0, 0)),
            ],
            out_specs=pl.BlockSpec((1, nb, hidden), lambda g: (g, 0, 0)),
            scratch_shapes=[pltpu.VMEM((rows2, 3 * c1), jnp.float32)],
        ),
        compiler_params=pltpu.CompilerParams(
            dimension_semantics=("parallel",)),
    )(x_rows, w1m, b1f, w2m, b2f, sel, wpm, bpf)

    return out.reshape(B, S, hidden)


def reference(x, params):
    """Pure-JAX float32 reference mirroring the PyTorch forward."""
    w1, b1, w2, b2, wp, bp = params
    B, S, C_in, T = x.shape
    h = x.reshape(B * S, C_in, T).transpose(0, 2, 1)            # (N, T, C)

    def conv_relu(h, w, b):                                     # w: (Cout, Cin, 3)
        wk = jnp.transpose(w, (2, 1, 0))                        # (3, Cin, Cout)
        hp = jnp.pad(h, ((0, 0), (1, 1), (0, 0)))
        y = (jnp.einsum('ntc,cd->ntd', hp[:, :-2], wk[0])
             + jnp.einsum('ntc,cd->ntd', hp[:, 1:-1], wk[1])
             + jnp.einsum('ntc,cd->ntd', hp[:, 2:], wk[2]) + b[None, None, :])
        return jnp.maximum(y, 0.0)

    def pool(h):
        n, t, c = h.shape
        return jnp.max(h.reshape(n, t // 2, 2, c), axis=2)

    h = pool(conv_relu(h, w1, b1))
    h = pool(conv_relu(h, w2, b2))
    m = h.mean(axis=1)                                          # (N, 128)
    out = m @ wp.T + bp
    return out.reshape(B, S, -1)


if __name__ == "__main__":
    B, S, C_in, T = 2, 4, 40, 16       # input_dim=40 (module default), seq=4, T=16
    hidden = 256                       # hidden_dim=256 (module default)

    key = jax.random.PRNGKey(0)
    ks = jax.random.split(key, 7)
    x = jax.random.normal(ks[0], (B, S, C_in, T), jnp.float32)

    # Synthetic parameters in PyTorch layouts (Conv1d: (Cout, Cin, k); Linear: (out, in)).
    w1 = jax.random.normal(ks[1], (64, C_in, 3), jnp.float32) * 0.05
    b1 = jax.random.normal(ks[2], (64,), jnp.float32) * 0.05
    w2 = jax.random.normal(ks[3], (128, 64, 3), jnp.float32) * 0.05
    b2 = jax.random.normal(ks[4], (128,), jnp.float32) * 0.05
    wp = jax.random.normal(ks[5], (hidden, 128), jnp.float32) * 0.05
    bp = jax.random.normal(ks[6], (hidden,), jnp.float32) * 0.05
    params = (w1, b1, w2, b2, wp, bp)

    out = jax.block_until_ready(jax.jit(audio_encoder)(x, params))
    ref = jax.block_until_ready(reference(x, params))

    assert out.shape == (B, S, hidden), out.shape
    # bf16 MXU operands with f32 accumulation -> loosened tolerance vs f32 ref.
    np.testing.assert_allclose(np.asarray(out), np.asarray(ref),
                               rtol=2e-2, atol=1e-2)
    print("KERNEL_OK")
</pallas_src>

<mosaic_0001>
module attributes {stable_mosaic.version = 11 : i64} {
  func.func @encoder_kernel(%arg0: i32, %arg1: memref<1x128x120xbf16, #tpu.memory_space<vmem>>, %arg2: memref<120x64xbf16, #tpu.memory_space<vmem>>, %arg3: memref<1x64xf32, #tpu.memory_space<vmem>>, %arg4: memref<192x128xbf16, #tpu.memory_space<vmem>>, %arg5: memref<1x128xf32, #tpu.memory_space<vmem>>, %arg6: memref<8x64xbf16, #tpu.memory_space<vmem>>, %arg7: memref<128x256xbf16, #tpu.memory_space<vmem>>, %arg8: memref<1x256xf32, #tpu.memory_space<vmem>>, %arg9: memref<1x8x256xf32, #tpu.memory_space<vmem>>, %arg10: memref<64x192xf32, #tpu.memory_space<vmem>>) attributes {dimension_semantics = [#tpu.dimension_semantics<parallel>], iteration_bounds = array<i64: 1>, scalar_prefetch = 0 : i64, scratch_operands = 1 : i64, tpu.core_type = #tpu.core_type<tc>, window_params = [{transform_indices = @transform_0, window_bounds = array<i64: 1, 128, 120>}, {pipeline_mode = #tpu.pipeline_mode<synchronous>, transform_indices = @transform_1, window_bounds = array<i64: 120, 64>}, {pipeline_mode = #tpu.pipeline_mode<synchronous>, transform_indices = @transform_2, window_bounds = array<i64: 1, 64>}, {pipeline_mode = #tpu.pipeline_mode<synchronous>, transform_indices = @transform_3, window_bounds = array<i64: 192, 128>}, {pipeline_mode = #tpu.pipeline_mode<synchronous>, transform_indices = @transform_4, window_bounds = array<i64: 1, 128>}, {pipeline_mode = #tpu.pipeline_mode<synchronous>, transform_indices = @transform_5, window_bounds = array<i64: 8, 64>}, {pipeline_mode = #tpu.pipeline_mode<synchronous>, transform_indices = @transform_6, window_bounds = array<i64: 128, 256>}, {pipeline_mode = #tpu.pipeline_mode<synchronous>, transform_indices = @transform_7, window_bounds = array<i64: 1, 256>}, {transform_indices = @transform_8, window_bounds = array<i64: 1, 8, 256>}]} {
    %c0 = arith.constant 0 : index
    %c0_0 = arith.constant 0 : index
    %c0_1 = arith.constant 0 : index
    %0 = vector.load %arg1[%c0, %c0_0, %c0_1] : memref<1x128x120xbf16, #tpu.memory_space<vmem>>, vector<1x128x120xbf16>
    %1 = vector.shape_cast %0 : vector<1x128x120xbf16> to vector<128x120xbf16>
    %c0_2 = arith.constant 0 : index
    %c0_3 = arith.constant 0 : index
    %2 = vector.load %arg2[%c0_2, %c0_3] : memref<120x64xbf16, #tpu.memory_space<vmem>>, vector<120x64xbf16>
    %cst = arith.constant dense<0.000000e+00> : vector<128x64xf32>
    %3 = tpu.matmul %1, %2, %cst {dimension_numbers = #tpu.dot_dimension_numbers<[1], [0], [0], [1], [0, 0, 1, 1], [], []>} : vector<128x120xbf16>, vector<120x64xbf16>, vector<128x64xf32> -> vector<128x64xf32>
    %c0_4 = arith.constant 0 : index
    %c0_5 = arith.constant 0 : index
    %4 = vector.load %arg3[%c0_4, %c0_5] : memref<1x64xf32, #tpu.memory_space<vmem>>, vector<1x64xf32>
    %5 = vector.broadcast %4 : vector<1x64xf32> to vector<128x64xf32>
    %6 = arith.addf %3, %5 : vector<128x64xf32>
    %cst_6 = arith.constant 0.000000e+00 : f32
    %7 = vector.broadcast %cst_6 : f32 to vector<128x64xf32>
    %8 = arith.maximumf %6, %7 : vector<128x64xf32>
    %9 = vector.extract_strided_slice %8 {offsets = [0, 0], sizes = [64, 64], strides = [1, 1]} : vector<128x64xf32> to vector<64x64xf32>
    %10 = vector.extract_strided_slice %8 {offsets = [64, 0], sizes = [64, 64], strides = [1, 1]} : vector<128x64xf32> to vector<64x64xf32>
    %11 = arith.maximumf %9, %10 : vector<64x64xf32>
    %12 = tpu.iota {dimensions = array<i32: 0>} : vector<64x1xi32>
    %c8_i32 = arith.constant 8 : i32
    %c0_i32 = arith.constant 0 : i32
    %13 = arith.cmpi eq, %c8_i32, %c0_i32 : i32
    %c1_i32 = arith.constant 1 : i32
    %14 = arith.select %13, %c1_i32, %c8_i32 : i32
    %15 = vector.broadcast %14 : i32 to vector<64x1xi32>
    %16 = arith.remsi %12, %15 : vector<64x1xi32>
    %c0_i32_7 = arith.constant 0 : i32
    %17 = vector.broadcast %c0_i32_7 : i32 to vector<64x1xi32>
    %18 = arith.cmpi ne, %16, %17 : vector<64x1xi32>
    %c0_i32_8 = arith.constant 0 : i32
    %19 = vector.broadcast %c0_i32_8 : i32 to vector<64x1xi32>
    %20 = arith.cmpi slt, %16, %19 : vector<64x1xi32>
    %c0_i32_9 = arith.constant 0 : i32
    %21 = arith.cmpi slt, %14, %c0_i32_9 : i32
    %22 = vector.broadcast %21 : i1 to vector<64x1xi1>
    %23 = vector.broadcast %22 : vector<64x1xi1> to vector<64x1xi1>
    %24 = arith.xori %20, %23 : vector<64x1xi1>
    %25 = arith.andi %24, %18 : vector<64x1xi1>
    %26 = vector.broadcast %14 : i32 to vector<64x1xi32>
    %27 = arith.addi %16, %26 : vector<64x1xi32>
    %28 = arith.select %25, %27, %16 : vector<64x1xi1>, vector<64x1xi32>
    %c0_i32_10 = arith.constant 0 : i32
    %29 = vector.broadcast %c0_i32_10 : i32 to vector<64x1xi32>
    %30 = arith.cmpi eq, %28, %29 : vector<64x1xi32>
    %c1_i32_11 = arith.constant 1 : i32
    %31 = tpu.dynamic_rotate %11 by %c1_i32_11 dim 0 : vector<64x64xf32>, i32 -> vector<64x64xf32>
    %cst_12 = arith.constant 0.000000e+00 : f32
    %32 = vector.shape_cast %30 : vector<64x1xi1> to vector<64x1xi1>
    %33 = vector.broadcast %32 : vector<64x1xi1> to vector<64x64xi1>
    %34 = vector.broadcast %cst_12 : f32 to vector<64x64xf32>
    %35 = arith.select %33, %34, %31 : vector<64x64xi1>, vector<64x64xf32>
    %c7_i32 = arith.constant 7 : i32
    %36 = vector.broadcast %c7_i32 : i32 to vector<64x1xi32>
    %37 = arith.cmpi eq, %28, %36 : vector<64x1xi32>
    %c63_i32 = arith.constant 63 : i32
    %38 = tpu.dynamic_rotate %11 by %c63_i32 dim 0 : vector<64x64xf32>, i32 -> vector<64x64xf32>
    %cst_13 = arith.constant 0.000000e+00 : f32
    %39 = vector.shape_cast %37 : vector<64x1xi1> to vector<64x1xi1>
    %40 = vector.broadcast %39 : vector<64x1xi1> to vector<64x64xi1>
    %41 = vector.broadcast %cst_13 : f32 to vector<64x64xf32>
    %42 = arith.select %40, %41, %38 : vector<64x64xi1>, vector<64x64xf32>
    %c0_14 = arith.constant 0 : index
    %c0_15 = arith.constant 0 : index
    %43 = vector.load %arg10[%c0_14, %c0_15] : memref<64x192xf32, #tpu.memory_space<vmem>>, vector<64x64xf32>
    tpu.vector_store %arg10[%c0_14, %c0_15], %35 {strides = array<i32>} : memref<64x192xf32, #tpu.memory_space<vmem>>, vector<64x64xf32>,
    %c0_16 = arith.constant 0 : index
    %c64 = arith.constant 64 : index
    %44 = vector.load %arg10[%c0_16, %c64] : memref<64x192xf32, #tpu.memory_space<vmem>>, vector<64x64xf32>
    tpu.vector_store %arg10[%c0_16, %c64], %11 {strides = array<i32>} : memref<64x192xf32, #tpu.memory_space<vmem>>, vector<64x64xf32>,
    %c0_17 = arith.constant 0 : index
    %c128 = arith.constant 128 : index
    %45 = vector.load %arg10[%c0_17, %c128] : memref<64x192xf32, #tpu.memory_space<vmem>>, vector<64x64xf32>
    tpu.vector_store %arg10[%c0_17, %c128], %42 {strides = array<i32>} : memref<64x192xf32, #tpu.memory_space<vmem>>, vector<64x64xf32>,
    %c0_18 = arith.constant 0 : index
    %c0_19 = arith.constant 0 : index
    %46 = vector.load %arg10[%c0_18, %c0_19] : memref<64x192xf32, #tpu.memory_space<vmem>>, vector<64x192xf32>
    %47 = arith.truncf %46 : vector<64x192xf32> to vector<64x192xbf16>
    %c0_20 = arith.constant 0 : index
    %c0_21 = arith.constant 0 : index
    %48 = vector.load %arg4[%c0_20, %c0_21] : memref<192x128xbf16, #tpu.memory_space<vmem>>, vector<192x128xbf16>
    %cst_22 = arith.constant dense<0.000000e+00> : vector<64x128xf32>
    %49 = tpu.matmul %47, %48, %cst_22 {dimension_numbers = #tpu.dot_dimension_numbers<[1], [0], [0], [1], [0, 0, 1, 1], [], []>} : vector<64x192xbf16>, vector<192x128xbf16>, vector<64x128xf32> -> vector<64x128xf32>
    %c0_23 = arith.constant 0 : index
    %c0_24 = arith.constant 0 : index
    %50 = vector.load %arg5[%c0_23, %c0_24] : memref<1x128xf32, #tpu.memory_space<vmem>>, vector<1x128xf32>
    %51 = vector.broadcast %50 : vector<1x128xf32> to vector<64x128xf32>
    %52 = arith.addf %49, %51 : vector<64x128xf32>
    %cst_25 = arith.constant 0.000000e+00 : f32
    %53 = vector.broadcast %cst_25 : f32 to vector<64x128xf32>
    %54 = arith.maximumf %52, %53 : vector<64x128xf32>
    %c63_i32_26 = arith.constant 63 : i32
    %55 = tpu.dynamic_rotate %54 by %c63_i32_26 dim 0 : vector<64x128xf32>, i32 -> vector<64x128xf32>
    %56 = arith.maximumf %54, %55 : vector<64x128xf32>
    %c0_27 = arith.constant 0 : index
    %c0_28 = arith.constant 0 : index
    %57 = vector.load %arg6[%c0_27, %c0_28] : memref<8x64xbf16, #tpu.memory_space<vmem>>, vector<8x64xbf16>
    %58 = arith.truncf %56 : vector<64x128xf32> to vector<64x128xbf16>
    %cst_29 = arith.constant dense<0.000000e+00> : vector<8x128xf32>
    %59 = tpu.matmul %57, %58, %cst_29 {dimension_numbers = #tpu.dot_dimension_numbers<[1], [0], [0], [1], [0, 0, 1, 1], [], []>} : vector<8x64xbf16>, vector<64x128xbf16>, vector<8x128xf32> -> vector<8x128xf32>
    %60 = arith.truncf %59 : vector<8x128xf32> to vector<8x128xbf16>
    %c0_30 = arith.constant 0 : index
    %c0_31 = arith.constant 0 : index
    %61 = vector.load %arg7[%c0_30, %c0_31] : memref<128x256xbf16, #tpu.memory_space<vmem>>, vector<128x256xbf16>
    %cst_32 = arith.constant dense<0.000000e+00> : vector<8x256xf32>
    %62 = tpu.matmul %60, %61, %cst_32 {dimension_numbers = #tpu.dot_dimension_numbers<[1], [0], [0], [1], [0, 0, 1, 1], [], []>} : vector<8x128xbf16>, vector<128x256xbf16>, vector<8x256xf32> -> vector<8x256xf32>
    %c0_33 = arith.constant 0 : index
    %c0_34 = arith.constant 0 : index
    %63 = vector.load %arg8[%c0_33, %c0_34] : memref<1x256xf32, #tpu.memory_space<vmem>>, vector<1x256xf32>
    %64 = vector.broadcast %63 : vector<1x256xf32> to vector<8x256xf32>
    %65 = arith.addf %62, %64 : vector<8x256xf32>
    %c0_35 = arith.constant 0 : index
    %c0_36 = arith.constant 0 : index
    %c0_37 = arith.constant 0 : index
    %66 = vector.load %arg9[%c0_35, %c0_36, %c0_37] : memref<1x8x256xf32, #tpu.memory_space<vmem>>, vector<1x8x256xf32>
    %67 = vector.shape_cast %66 : vector<1x8x256xf32> to vector<8x256xf32>
    %68 = vector.shape_cast %65 : vector<8x256xf32> to vector<1x8x256xf32>
    tpu.vector_store %arg9[%c0_35, %c0_36, %c0_37], %68 {strides = array<i32>} : memref<1x8x256xf32, #tpu.memory_space<vmem>>, vector<1x8x256xf32>,
    return
  }
  func.func @transform_0(%arg0: i32) -> (i32, i32, i32) {
    %c0_i32 = arith.constant 0 : i32
    %c0_i32_0 = arith.constant 0 : i32
    %c0_i32_1 = arith.constant 0 : i32
    return %arg0, %c0_i32, %c0_i32_0 : i32, i32, i32
  }
  func.func @transform_1(%arg0: i32) -> (i32, i32) {
    %c0_i32 = arith.constant 0 : i32
    %c0_i32_0 = arith.constant 0 : i32
    %c0_i32_1 = arith.constant 0 : i32
    return %c0_i32, %c0_i32_0 : i32, i32
  }
  func.func @transform_2(%arg0: i32) -> (i32, i32) {
    %c0_i32 = arith.constant 0 : i32
    %c0_i32_0 = arith.constant 0 : i32
    %c0_i32_1 = arith.constant 0 : i32
    return %c0_i32, %c0_i32_0 : i32, i32
  }
  func.func @transform_3(%arg0: i32) -> (i32, i32) {
    %c0_i32 = arith.constant 0 : i32
    %c0_i32_0 = arith.constant 0 : i32
    %c0_i32_1 = arith.constant 0 : i32
    return %c0_i32, %c0_i32_0 : i32, i32
  }
  func.func @transform_4(%arg0: i32) -> (i32, i32) {
    %c0_i32 = arith.constant 0 : i32
    %c0_i32_0 = arith.constant 0 : i32
    %c0_i32_1 = arith.constant 0 : i32
    return %c0_i32, %c0_i32_0 : i32, i32
  }
  func.func @transform_5(%arg0: i32) -> (i32, i32) {
    %c0_i32 = arith.constant 0 : i32
    %c0_i32_0 = arith.constant 0 : i32
    %c0_i32_1 = arith.constant 0 : i32
    return %c0_i32, %c0_i32_0 : i32, i32
  }
  func.func @transform_6(%arg0: i32) -> (i32, i32) {
    %c0_i32 = arith.constant 0 : i32
    %c0_i32_0 = arith.constant 0 : i32
    %c0_i32_1 = arith.constant 0 : i32
    return %c0_i32, %c0_i32_0 : i32, i32
  }
  func.func @transform_7(%arg0: i32) -> (i32, i32) {
    %c0_i32 = arith.constant 0 : i32
    %c0_i32_0 = arith.constant 0 : i32
    %c0_i32_1 = arith.constant 0 : i32
    return %c0_i32, %c0_i32_0 : i32, i32
  }
  func.func @transform_8(%arg0: i32) -> (i32, i32, i32) {
    %c0_i32 = arith.constant 0 : i32
    %c0_i32_0 = arith.constant 0 : i32
    %c0_i32_1 = arith.constant 0 : i32
    return %arg0, %c0_i32, %c0_i32_0 : i32, i32, i32
  }
}

</mosaic_0001>

<bundles_post_ra>
// kernel: audio_encoder.1
= control target key start
LH: loop header
LB: loop body
LE: loop exit
PB: predicated region body
PF: predicated region fallthrough
CT: control target
= control target key end

     0   :  { %vm175_vm0 = vcmask 1043456   ;;  %vm150_vm1 = vcmask 982016   ;;  %v252_v25 = vlaneseq  ;;  %vm455_vm6 = vcmask 523264   ;;  %s1549_s1 = inlined_call_operand.vmem [shape: bf16[120,64], index: 1, kind: input, shape index: {}]   ;;  %s1550_s2 = inlined_call_operand.vmem [shape: f32[1,64], index: 2, kind: input, shape index: {}]   ;;  %s1551_s0 = inlined_call_operand.vmem [shape: bf16[1,128,120], index: 0, kind: input, shape index: {}]   ;;  %s1552_s3 = inlined_call_operand.vmem [shape: bf16[192,128], index: 3, kind: input, shape index: {}]   ;;  %s1553_s4 = inlined_call_operand.vmem [shape: f32[1,128], index: 4, kind: input, shape index: {}]   ;;  %s1554_s6 = inlined_call_operand.vmem [shape: bf16[128,256], index: 6, kind: input, shape index: {}]   ;;  %s1555_s5 = inlined_call_operand.vmem [shape: bf16[8,64], index: 5, kind: input, shape index: {}]   ;;  %s1556_s7 = inlined_call_operand.vmem [shape: f32[1,256], index: 7, kind: input, shape index: {}]   ;;  %s1557_s8 = inlined_call_operand.vmem [shape: f32[1,8,256], index: 8, kind: output, shape index: {}]  }
   0x1   :  { %v60_v0 = vld [vmem:[%s1549_s1 + $0x38] sm:$0xf]  ;;  %v1094_v4 = vld [vmem:[%s1549_s1 + $0x30] sm:$0xff]  ;;  %v1093_v5 = vld [vmem:[%s1549_s1 + $0x28] sm:$0xff] }
   0x2   :  { %v134_v1 = vunpack.c.l.b16 %v60_v0  ;;  %v1092_v6 = vld [vmem:[%s1549_s1 + $0x20] sm:$0xff]  ;;  %v1091_v7 = vld [vmem:[%s1549_s1 + $0x18] sm:$0xff]  ;;  %v1090_v8 = vld [vmem:[%s1549_s1 + $0x10] sm:$0xff]  ;;  %v1239_v29 = vshrl.u32 %v252_v25, 7 }
   0x3   :  { %v1089_v9 = vld [vmem:[%s1549_s1 + $0x8] sm:$0xff]  ;;  %v1088_v10 = vld [vmem:[%s1549_s1] sm:$0xff]  ;;  %v1086_v14 = vld [vmem:[%s1551_s0 + $0x30] sm:$0xff] }
   0x4   :  { %v142_v2 = vpack.c.b16 %v134_v1, %v134_v1  ;;  %v1080_v11 = vld [vmem:[%s1551_s0] sm:$0xff]  ;;  %v1085_v12 = vld [vmem:[%s1551_s0 + $0x28] sm:$0xff]  ;;  %v1082_v15 = vld [vmem:[%s1551_s0 + $0x10] sm:$0xff]  ;;  %v1245_v33 = vadd.s32 16, %v1239_v29  ;;  %v256_v35 = vadd.s32 24, %v1239_v29  ;;  %vm422_vm2 = vcmp.lt.s32.totalorder %v1239_v29, 7 }
   0x5   :  { %v1081_v13 = vld [vmem:[%s1551_s0 + $0x8] sm:$0xff]  ;;  %v1087_v16 = vld [vmem:[%s1551_s0 + $0x38] sm:$0xff]  ;;  %v1084_v18 = vld [vmem:[%s1551_s0 + $0x20] sm:$0xff]  ;;  %v257_v46 = vadd.s32 32, %v1239_v29  ;;  %vm373_vm4 = vcmp.lt.s32.totalorder %v1239_v29, 1 }
   0x6   :  { %v177_v3 = vsel %vm175_vm0, %v142_v2, 0  ;;  %v1083_v17 = vld [vmem:[%s1551_s0 + $0x18] sm:$0xff]  ;;  %v1235_v22 = vld [vmem:[%s1550_s2] ss:$0 sm:$0xff]  ;;  %s1134_s0 = smov 64   ;;  %v279_v39 = vand.u32 7, %v1245_v33 }
   0x7   :  { %179 = vmatpush.bf16.msra.mxu0 %v177_v3  ;;  %1123 = vmatpush.bf16.msra.mxu3 %v177_v3  ;;  %v286_v40 = vand.u32 7, %v256_v35  ;;  %v293_v60 = vand.u32 7, %v257_v46  ;;  %v258_v3 = vadd.s32 40, %v1239_v29  ;;  %v1105_v25 = vld [vmem:[%s1552_s3 + $0x50] sm:$0xff]  ;;  %v1104_v35 = vld [vmem:[%s1552_s3 + $0x48] sm:$0xff] }
   0x8   :  { %vm1256_vm3 = vcmp.eq.s32.totalorder %v279_v39, 7 }
   0x9   :  { %vm1262_vm5 = vcmp.eq.s32.totalorder %v286_v40, 0  ;;  %vm409_vm7 = vcmp.eq.s32.totalorder %v286_v40, 7  ;;  %vm361_vm8 = vcmp.eq.s32.totalorder %v293_v60, 0  ;;  %vm410_vm9 = vcmp.eq.s32.totalorder %v293_v60, 7 }
   0xb   :  { %180 = vmatpush.bf16.msra.mxu0 %v1094_v4  ;;  %1124 = vmatpush.bf16.msra.mxu3 %v1094_v4 }
   0xf   :  { %181 = vmatpush.bf16.msra.mxu0 %v1093_v5  ;;  %1125 = vmatpush.bf16.msra.mxu3 %v1093_v5 }
  0x13   :  { %182 = vmatpush.bf16.msra.mxu0 %v1092_v6  ;;  %1126 = vmatpush.bf16.msra.mxu3 %v1092_v6 }
  0x17   :  { %183 = vmatpush.bf16.msra.mxu0 %v1091_v7  ;;  %1127 = vmatpush.bf16.msra.mxu3 %v1091_v7 }
  0x1b   :  { %184 = vmatpush.bf16.msra.mxu0 %v1090_v8  ;;  %1128 = vmatpush.bf16.msra.mxu3 %v1090_v8 }
  0x1f   :  { %185 = vmatpush.bf16.msra.mxu0 %v1089_v9  ;;  %1129 = vmatpush.bf16.msra.mxu3 %v1089_v9 }
  0x23   :  { %186 = vmatpush.bf16.msra.mxu0 %v1088_v10  ;;  %1130 = vmatpush.bf16.msra.mxu3 %v1088_v10 }
  0x26   :  { %955 = vmatmul.msk.bf16.vlgmr.msra.gmra.mxu0 %vm150_vm1, %v1080_v11  ;;  %960 = vmatmul.msk.bf16.vlgmr.msra.gmra.mxu3 %vm150_vm1, %v1085_v12  ;;  %v300_v11 = vand.u32 7, %v258_v3 }
  0x28   :  { %vm362_vm10 = vcmp.eq.s32.totalorder %v300_v11, 0  ;;  %vm411_vm11 = vcmp.eq.s32.totalorder %v300_v11, 7 }
  0x36   :  { %956 = vmatmul.msk.bf16.gmra.mxu0 %vm150_vm1, %v1081_v13  ;;  %961 = vmatmul.msk.bf16.gmra.mxu3 %vm150_vm1, %v1086_v14  ;;  %v1106_v14 = vld [vmem:[%s1552_s3 + $0x58] sm:$0xff] }
  0x37   :  { %682 = vmatpush.bf16.msra.mxu2 %v1106_v14 }
  0x3b   :  { %683 = vmatpush.bf16.msra.mxu2 %v1105_v25 }
  0x3f   :  { %684 = vmatpush.bf16.msra.mxu2 %v1104_v35 }
  0x46   :  { %957 = vmatmul.msk.bf16.gmra.mxu0 %vm150_vm1, %v1082_v15  ;;  %962 = vmatmul.msk.bf16.gmra.mxu3 %vm150_vm1, %v1087_v16 }
  0x56   :  { %958 = vmatmul.msk.bf16.gmra.mxu0 %vm150_vm1, %v1083_v17  ;;  %v259_v17 = vadd.s32 48, %v1239_v29 }
  0x66   :  { %959 = vmatmul.msk.bf16.gmra.mxu0 %vm150_vm1, %v1084_v18 }
  0xa3   :  { %v1228_v19 = vpop.f32.mrf.mxu0 }
  0xa9   :  { %v213_v20 = vpop.f32.mrf.mxu3 }
  0xaa   :  { %v214_v23 = vadd.f32 %v1235_v22, %v213_v20 }
  0xab   :  { %v1230_v21 = vpop.f32.mrf.mxu0 }
  0xac   :  { %v238_v28 = vmax.f32 %v214_v23, 0.0  ;;  %v191_v3 = vadd.f32 %v1235_v22, %v1230_v21 }
  0xae   :  { %v229_v21 = vmax.f32 %v191_v3, 0.0 }
  0xb1   :  { %v215_v24 = vpop.f32.mrf.mxu3 }
  0xb2   :  { %v216_v32 = vadd.f32 %v1235_v22, %v215_v24 }
  0xb3   :  { %v193_v26 = vpop.f32.mrf.mxu0 }
  0xb4   :  { %v194_v27 = vadd.f32 %v1235_v22, %v193_v26  ;;  %v239_v38 = vmax.f32 %v216_v32, 0.0  ;;  %v307_v32 = vand.u32 7, %v259_v17 }
  0xb6   :  { %v230_v30 = vmax.f32 %v194_v27, 0.0  ;;  %vm363_vm12 = vcmp.eq.s32.totalorder %v307_v32, 0  ;;  %vm412_vm13 = vcmp.eq.s32.totalorder %v307_v32, 7  ;;  %v1101_v32 = vld [vmem:[%s1552_s3 + $0x30] sm:$0xff] }
  0xb8   :  { %v1241_v31 = vmax.f32 %v230_v30, %v238_v28 }
  0xb9   :  { %v218_v34 = vpop.f32.mrf.mxu3 }
  0xba   :  { %476 = vrot.lane.b32.xlu1 %v1241_v31, %s1134_s0  ;;  %v219_v43 = vadd.f32 %v1235_v22, %v218_v34  ;;  %v367_v48 = vrot.slane %v1241_v31, 7  ;;  %v416_v49 = vrot.slane %v1241_v31, 1 }
  0xbb   :  { %v195_v36 = vpop.f32.mrf.mxu0 }
  0xbc   :  { %v196_v37 = vadd.f32 %v1235_v22, %v195_v36  ;;  %v240_v55 = vmax.f32 %v219_v43, 0.0 }
  0xbe   :  { %v231_v41 = vmax.f32 %v196_v37, 0.0 }
  0xc0   :  { %v247_v42 = vmax.f32 %v231_v41, %v239_v38  ;;  %v260_v41 = vadd.s32 56, %v1239_v29 }
  0xc1   :  { %v220_v45 = vpop.f32.mrf.mxu3 }
  0xc2   :  { %v368_v50 = vrot.slane %v247_v42, 7  ;;  %v417_v51 = vrot.slane %v247_v42, 1  ;;  %478 = vrot.lane.b32.xlu1 %v247_v42, %s1134_s0  ;;  %v221_v62 = vadd.f32 %v1235_v22, %v220_v45  ;;  %v1103_v42 = vld [vmem:[%s1552_s3 + $0x40] sm:$0xff] }
  0xc3   :  { %v198_v52 = vpop.f32.mrf.mxu0  ;;  %685 = vmatpush.bf16.msra.mxu2 %v1103_v42 }
  0xc4   :  { %v427_v53 = vsel %vm422_vm2, %v416_v49, %v417_v51  ;;  %v199_v54 = vadd.f32 %v1235_v22, %v198_v52  ;;  %v378_v56 = vsel %vm373_vm4, %v367_v48, %v368_v50  ;;  %v241_v6 = vmax.f32 %v221_v62, 0.0 }
  0xc5   :  { %v449_v57 = vsel %vm1256_vm3, 0.0, %v427_v53  ;;  %v401_v58 = vsel %vm1262_vm5, 0.0, %v378_v56  ;;  %v314_v53 = vand.u32 7, %v260_v41  ;;  %vm359_vm5 = vcmp.eq.s32.totalorder %v279_v39, 0 }
  0xc6   :  { %507 = vst.msk [vmem:[#allocation2 + $0x28] sm:$0xff] %vm455_vm6, %v449_v57  ;;  %v232_v59 = vmax.f32 %v199_v54, 0.0 }
  0xc7   :  { %459 = vst.msk [vmem:[#allocation2 + $0x30] sm:$0xff] %vm455_vm6, %v401_v58  ;;  %vm364_vm14 = vcmp.eq.s32.totalorder %v314_v53, 0  ;;  %vm413_vm15 = vcmp.eq.s32.totalorder %v314_v53, 7 }
  0xc8   :  { %v248_v61 = vmax.f32 %v232_v59, %v240_v55  ;;  %v189_v55 = vadd.f32 %v1235_v22, %v1228_v19 }
  0xc9   :  { %v223_v2 = vpop.f32.mrf.mxu3 }
  0xca   :  { %v369_v63 = vrot.slane %v248_v61, 7  ;;  %v418_v0 = vrot.slane %v248_v61, 1  ;;  %480 = vrot.lane.b32.xlu2 %v248_v61, %s1134_s0  ;;  %v224_v13 = vadd.f32 %v1235_v22, %v223_v2 }
  0xcb   :  { %v200_v1 = vpop.f32.mrf.mxu0 }
  0xcc   :  { %v426_v4 = vsel %vm422_vm2, %v417_v51, %v418_v0  ;;  %v201_v5 = vadd.f32 %v1235_v22, %v200_v1  ;;  %v377_v7 = vsel %vm373_vm4, %v368_v50, %v369_v63  ;;  %v242_v24 = vmax.f32 %v224_v13, 0.0 }
  0xcd   :  { %v450_v8 = vsel %vm409_vm7, 0.0, %v426_v4  ;;  %v402_v9 = vsel %vm361_vm8, 0.0, %v377_v7  ;;  %v265_v1 = vand.u32 7, %v1239_v29 }
  0xce   :  { %508 = vst.msk [vmem:[#allocation2 + $0x38] sm:$0xff] %vm455_vm6, %v450_v8  ;;  %v233_v10 = vmax.f32 %v201_v5, 0.0 }
  0xcf   :  { %460 = vst.msk [vmem:[#allocation2 + $0x40] sm:$0xff] %vm455_vm6, %v402_v9  ;;  %vm357_vm0 = vcmp.eq.s32.totalorder %v265_v1, 0  ;;  %vm406_vm1 = vcmp.eq.s32.totalorder %v265_v1, 7 }
  0xd0   :  { %v249_v12 = vmax.f32 %v233_v10, %v241_v6  ;;  %v254_v6 = vadd.s32 8, %v1239_v29 }
  0xd1   :  { %v225_v27 = vpop.f32.mrf.mxu3 }
  0xd2   :  { %v370_v15 = vrot.slane %v249_v12, 7  ;;  %v419_v16 = vrot.slane %v249_v12, 1  ;;  %482 = vrot.lane.b32.xlu2 %v249_v12, %s1134_s0  ;;  %v226_v37 = vadd.f32 %v1235_v22, %v225_v27  ;;  %v272_v14 = vand.u32 7, %v254_v6  ;;  %v518_v27 = vld [vmem:[#allocation2 + $0x28] sm:$0xff] }
  0xd3   :  { %v203_v18 = vpop.f32.mrf.mxu0 }
  0xd4   :  { %v425_v20 = vsel %vm422_vm2, %v418_v0, %v419_v16  ;;  %v204_v23 = vadd.f32 %v1235_v22, %v203_v18  ;;  %v376_v28 = vsel %vm373_vm4, %v369_v63, %v370_v15  ;;  %v243_v46 = vmax.f32 %v226_v37, 0.0 }
  0xd5   :  { %v451_v26 = vsel %vm410_vm9, 0.0, %v425_v20  ;;  %v403_v34 = vsel %vm362_vm10, 0.0, %v376_v28  ;;  %v228_v0 = vmax.f32 %v189_v55, 0.0  ;;  %vm407_vm3 = vcmp.eq.s32.totalorder %v272_v14, 7 }
  0xd6   :  { %509 = vst.msk [vmem:[#allocation2 + $0x48] sm:$0xff] %vm455_vm6, %v451_v26  ;;  %v234_v30 = vmax.f32 %v204_v23, 0.0  ;;  %vm358_vm7 = vcmp.eq.s32.totalorder %v272_v14, 0  ;;  %v520_v26 = vld [vmem:[#allocation2 + $0x38] sm:$0xff] }
  0xd7   :  { %461 = vst.msk [vmem:[#allocation2 + $0x50] sm:$0xff] %vm455_vm6, %v403_v34  ;;  %v532_v28 = vpack.c.bf16 %v520_v26, %v518_v27  ;;  %v1068_v26 = vld [vmem:[%s1554_s6 + $0x68] sm:$0xf0]  ;;  %v1074_v27 = vld [vmem:[%s1554_s6 + $0x70] sm:$0xf] }
  0xd8   :  { %v1313_v36 = vmax.f32 %v234_v30, %v242_v24  ;;  %v1102_v30 = vld [vmem:[%s1552_s3 + $0x38] sm:$0xff] }
  0xd9   :  { %649 = vmatpush.bf16.msra.mxu1 %v1102_v30  ;;  %v1122_v30 = vld [vmem:[%s1554_s6 + $0x74] sm:$0xf0] }
  0xda   :  { %v371_v38 = vrot.slane %v1313_v36, 7  ;;  %v420_v40 = vrot.slane %v1313_v36, 1 }
  0xdb   :  { %v205_v43 = vpop.f32.mrf.mxu0 }
  0xdc   :  { %v424_v44 = vsel %vm422_vm2, %v419_v16, %v420_v40  ;;  %v206_v45 = vadd.f32 %v1235_v22, %v205_v43  ;;  %v375_v47 = vsel %vm373_vm4, %v370_v15, %v371_v38 }
  0xdd   :  { %v452_v50 = vsel %vm411_vm11, 0.0, %v424_v44  ;;  %v404_v51 = vsel %vm363_vm12, 0.0, %v375_v47  ;;  %650 = vmatpush.bf16.msra.mxu1 %v1101_v32  ;;  %v522_v35 = vld [vmem:[#allocation2 + $0x48] sm:$0xff]  ;;  %v1098_v47 = vld [vmem:[%s1552_s3 + $0x18] sm:$0xff] }
  0xde   :  { %510 = vst.msk [vmem:[#allocation2 + $0x58] sm:$0xff] %vm455_vm6, %v452_v50  ;;  %v235_v52 = vmax.f32 %v206_v45, 0.0  ;;  %v1100_v45 = vld [vmem:[%s1552_s3 + $0x28] sm:$0xff]  ;;  %v1097_v50 = vld [vmem:[%s1552_s3 + $0x10] sm:$0xff] }
  0xdf   :  { %462 = vst.msk [vmem:[#allocation2 + $0x60] sm:$0xff] %vm455_vm6, %v404_v51  ;;  %v1096_v51 = vld [vmem:[%s1552_s3 + $0x8] sm:$0xff] }
  0xe0   :  { %v251_v54 = vmax.f32 %v235_v52, %v243_v46  ;;  %v1099_v46 = vld [vmem:[%s1552_s3 + $0x20] sm:$0xff] }
  0xe1   :  { %651 = vmatpush.bf16.msra.mxu1 %v1100_v45  ;;  %v1095_v52 = vld [vmem:[%s1552_s3] sm:$0xff] }
  0xe2   :  { %v372_v56 = vrot.slane %v251_v54, 7  ;;  %v421_v57 = vrot.slane %v251_v54, 1  ;;  %486 = vrot.lane.b32.xlu1 %v251_v54, %s1134_s0 }
  0xe3   :  { %v208_v58 = vpop.f32.mrf.mxu0 }
  0xe4   :  { %v423_v59 = vsel %vm422_vm2, %v420_v40, %v421_v57  ;;  %v209_v60 = vadd.f32 %v1235_v22, %v208_v58  ;;  %v374_v61 = vsel %vm373_vm4, %v371_v38, %v372_v56 }
  0xe5   :  { %v453_v62 = vsel %vm412_vm13, 0.0, %v423_v59  ;;  %v405_v63 = vsel %vm364_vm14, 0.0, %v374_v61  ;;  %v524_v34 = vld [vmem:[#allocation2 + $0x58] sm:$0xff]  ;;  %652 = vmatpush.bf16.msra.mxu1 %v1099_v46 }
  0xe6   :  { %511 = vst.msk [vmem:[#allocation2 + $0x68] sm:$0xff] %vm455_vm6, %v453_v62  ;;  %v236_v19 = vmax.f32 %v209_v60, 0.0 }
  0xe7   :  { %463 = vst.msk [vmem:[#allocation2 + $0x70] sm:$0xff] %vm455_vm6, %v405_v63 }
  0xe8   :  { %v244_v2 = vmax.f32 %v228_v0, %v236_v19 }
  0xe9   :  { %653 = vmatpush.bf16.msra.mxu1 %v1098_v47 }
  0xea   :  { %v365_v4 = vrot.slane %v244_v2, 7  ;;  %v414_v5 = vrot.slane %v244_v2, 1  ;;  %472 = vrot.lane.b32.xlu0 %v244_v2, %s1134_s0 }
  0xeb   :  { %v210_v7 = vpop.f32.mrf.mxu0 }
  0xec   :  { %v430_v8 = vsel %vm422_vm2, %v421_v57, %v414_v5  ;;  %v211_v9 = vadd.f32 %v1235_v22, %v210_v7  ;;  %v381_v10 = vsel %vm373_vm4, %v372_v56, %v365_v4 }
  0xed   :  { %v454_v11 = vsel %vm413_vm15, 0.0, %v430_v8  ;;  %v398_v12 = vsel %vm357_vm0, 0.0, %v381_v10  ;;  %v526_v42 = vld [vmem:[#allocation2 + $0x68] sm:$0xff]  ;;  %654 = vmatpush.bf16.msra.mxu1 %v1097_v50 }
  0xee   :  { %512 = vst.msk [vmem:[#allocation2 + $0x78] sm:$0xff] %vm455_vm6, %v454_v11  ;;  %v237_v13 = vmax.f32 %v211_v9, 0.0 }
  0xef   :  { %456 = vst.msk [vmem:[#allocation2] sm:$0xff] %vm455_vm6, %v398_v12 }
  0xf0   :  { %v245_v15 = vmax.f32 %v229_v21, %v237_v13 }
  0xf1   :  { %655 = vmatpush.bf16.msra.mxu1 %v1096_v51 }
  0xf2   :  { %v366_v16 = vrot.slane %v245_v15, 7  ;;  %v415_v17 = vrot.slane %v245_v15, 1  ;;  %474 = vrot.lane.b32.xlu0 %v245_v15, %s1134_s0  ;;  %v1133_v15 = vld [vmem:[%s1553_s4] ss:$0 sm:$0xff] }
  0xf4   :  { %v428_v22 = vsel %vm422_vm2, %v415_v17, %v416_v49  ;;  %v429_v18 = vsel %vm422_vm2, %v414_v5, %v415_v17  ;;  %v379_v20 = vsel %vm373_vm4, %v366_v16, %v367_v48  ;;  %v380_v23 = vsel %vm373_vm4, %v365_v4, %v366_v16 }
  0xf5   :  { %v447_v24 = vsel %vm406_vm1, 0.0, %v429_v18  ;;  %v448_v33 = vsel %vm407_vm3, 0.0, %v428_v22  ;;  %v400_v39 = vsel %vm359_vm5, 0.0, %v379_v20  ;;  %v399_v25 = vsel %vm358_vm7, 0.0, %v380_v23  ;;  %v528_v41 = vld [vmem:[#allocation2 + $0x78] sm:$0xff]  ;;  %656 = vmatpush.bf16.msra.mxu1 %v1095_v52 }
  0xf6   :  { %505 = vst.msk [vmem:[#allocation2 + $0x8] sm:$0xff] %vm455_vm6, %v447_v24  ;;  %vm496_vm4 = vcmask 1048064   ;;  %v536_v43 = vpack.c.bf16 %v528_v41, %v526_v42 }
  0xf7   :  { %506 = vst.msk [vmem:[#allocation2 + $0x18] sm:$0xff] %vm455_vm6, %v448_v33  ;;  %v1121_v33 = vld [vmem:[%s1554_s6 + $0x74] sm:$0xf] }
  0xf8   :  { %458 = vst.msk [vmem:[#allocation2 + $0x20] sm:$0xff] %vm455_vm6, %v400_v39  ;;  %v1076_v39 = vld [vmem:[%s1554_s6 + $0x78] sm:$0xf0] }
  0xf9   :  { %457 = vst.msk [vmem:[#allocation2 + $0x10] sm:$0xff] %vm455_vm6, %v399_v25 }
  0xfa   :  { %484 = vrot.lane.b32.xlu0 %v1313_v36, %s1134_s0  ;;  %v534_v36 = vpack.c.bf16 %v524_v34, %v522_v35 }
  0xfd   :  { %v514_v31 = vld [vmem:[#allocation2 + $0x8] sm:$0xff] }
  0xfe   :  { %v516_v48 = vld [vmem:[#allocation2 + $0x18] sm:$0xff] }
  0xff   :  { %v530_v49 = vpack.c.bf16 %v516_v48, %v514_v31  ;;  %v1079_v48 = vor.u32 %v1121_v33, %v1076_v39 }
 0x101   :  { %1011 = vmatmul.msk.bf16.vlgmr.msra.gmra.mxu2 %vm455_vm6, %v530_v49  ;;  %v1119_v49 = vld [vmem:[%s1554_s6 + $0x64] sm:$0xf] }
 0x102   :  { %876 = vmatpush.bf16.msrb.mxu2 %v1079_v48  ;;  %v1111_v48 = vld [vmem:[%s1554_s6 + $0x24] sm:$0xf] }
 0x111   :  { %1012 = vmatmul.msk.bf16.gmra.mxu2 %vm455_vm6, %v532_v28 }
 0x121   :  { %1013 = vmatmul.msk.bf16.gmra.mxu2 %vm455_vm6, %v534_v36  ;;  %v1071_v36 = vor.u32 %v1119_v49, %v1068_v26  ;;  %v1036_v49 = vld [vmem:[%s1554_s6 + $0x28] sm:$0xf0] }
 0x123   :  { %877 = vmatpush.bf16.msrb.mxu2 %v1071_v36 }
 0x124   :  { %v481_v37 = vpop.permute.xlu2 %480 }
 0x125   :  { %501 = vst.msk [vmem:[#allocation2 + $0x40] sm:$0xff] %vm496_vm4, %v481_v37  ;;  %v1075_v37 = vor.u32 %v1122_v30, %v1074_v27 }
 0x127   :  { %863 = vmatpush.bf16.msrb.mxu3 %v1075_v37  ;;  %v1039_v37 = vor.u32 %v1111_v48, %v1036_v49 }
 0x12c   :  { %v483_v38 = vpop.permute.xlu2 %482  ;;  %v477_v40 = vpop.permute.xlu1 %476  ;;  %v521_v0 = vld [vmem:[#allocation2 + $0x40] sm:$0xff] }
 0x12d   :  { %502 = vst.msk [vmem:[#allocation2 + $0x50] sm:$0xff] %vm496_vm4, %v483_v38  ;;  %v1066_v38 = vld [vmem:[%s1554_s6 + $0x60] sm:$0xf] }
 0x12e   :  { %499 = vst.msk [vmem:[#allocation2 + $0x20] sm:$0xff] %vm496_vm4, %v477_v40  ;;  %v1120_v40 = vld [vmem:[%s1554_s6 + $0x64] sm:$0xf0] }
 0x12f   :  { %v1067_v50 = vor.u32 %v1120_v40, %v1066_v38  ;;  %v1109_v40 = vld [vmem:[%s1554_s6 + $0x14] sm:$0xf] }
 0x131   :  { %1014 = vmatmul.msk.bf16.gmra.mxu2 %vm455_vm6, %v536_v43  ;;  %v1117_v43 = vld [vmem:[%s1554_s6 + $0x54] sm:$0xf]  ;;  %864 = vmatpush.bf16.msrb.mxu3 %v1067_v50 }
 0x134   :  { %v479_v44 = vpop.permute.xlu1 %478  ;;  %v523_v63 = vld [vmem:[#allocation2 + $0x50] sm:$0xff] }
 0x135   :  { %500 = vst.msk [vmem:[#allocation2 + $0x30] sm:$0xff] %vm496_vm4, %v479_v44  ;;  %v517_v61 = vld [vmem:[#allocation2 + $0x20] sm:$0xff]  ;;  %v533_v19 = vpack.c.bf16 %v523_v63, %v521_v0  ;;  %v1060_v44 = vld [vmem:[%s1554_s6 + $0x58] sm:$0xf0] }
 0x13c   :  { %v519_v60 = vld [vmem:[#allocation2 + $0x30] sm:$0xff] }
 0x13d   :  { %v531_v62 = vpack.c.bf16 %v519_v60, %v517_v61  ;;  %v1115_v61 = vld [vmem:[%s1554_s6 + $0x44] sm:$0xf] }
 0x154   :  { %v487_v53 = vpop.permute.xlu1 %486 }
 0x155   :  { %504 = vst.msk [vmem:[#allocation2 + $0x70] sm:$0xff] %vm496_vm4, %v487_v53 }
 0x15c   :  { %v473_v54 = vpop.permute.xlu0 %472  ;;  %v527_v2 = vld [vmem:[#allocation2 + $0x70] sm:$0xff] }
 0x15d   :  { %497 = vst.msk [vmem:[#allocation2] sm:$0xff] %vm496_vm4, %v473_v54  ;;  %v1058_v54 = vld [vmem:[%s1554_s6 + $0x50] sm:$0xf] }
 0x164   :  { %v475_v55 = vpop.permute.xlu0 %474  ;;  %v513_v57 = vld [vmem:[#allocation2] sm:$0xff] }
 0x165   :  { %498 = vst.msk [vmem:[#allocation2 + $0x10] sm:$0xff] %vm496_vm4, %v475_v55  ;;  %v1118_v55 = vld [vmem:[%s1554_s6 + $0x54] sm:$0xf0] }
 0x16c   :  { %v485_v56 = vpop.permute.xlu0 %484  ;;  %v515_v58 = vld [vmem:[#allocation2 + $0x10] sm:$0xff] }
 0x16d   :  { %503 = vst.msk [vmem:[#allocation2 + $0x60] sm:$0xff] %vm496_vm4, %v485_v56  ;;  %v529_v59 = vpack.c.bf16 %v515_v58, %v513_v57  ;;  %v1063_v58 = vor.u32 %v1117_v43, %v1060_v44 }
 0x16f   :  { %657 = vmatmul.bf16.vlgmr.msra.gmra.mxu1 %v529_v59  ;;  %878 = vmatpush.bf16.msrb.mxu2 %v1063_v58  ;;  %v1020_v58 = vld [vmem:[%s1554_s6 + $0x8] sm:$0xf0] }
 0x174   :  { %v525_v1 = vld [vmem:[#allocation2 + $0x60] sm:$0xff] }
 0x175   :  { %v535_v3 = vpack.c.bf16 %v527_v2, %v525_v1 }
 0x17f   :  { %662 = vmatmul.bf16.gmra.mxu1 %v531_v62  ;;  %v1052_v62 = vld [vmem:[%s1554_s6 + $0x48] sm:$0xf0] }
 0x184   :  { %v687_v4 = vpop.f32.mrf.mxu2 }
 0x18c   :  { %v1408_v5 = vpop.f32.mrf.mxu2 }
 0x18f   :  { %667 = vmatmul.bf16.gmra.mxu1 %v533_v19  ;;  %v1059_v19 = vor.u32 %v1118_v55, %v1058_v54  ;;  %v739_v55 = vld [vmem:[%s1555_s5] sm:$0xf] }
 0x191   :  { %865 = vmatpush.bf16.msrb.mxu3 %v1059_v19 }
 0x194   :  { %v692_v7 = vpop.f32.mrf.mxu2 }
 0x19c   :  { %v694_v10 = vpop.f32.mrf.mxu2 }
 0x19f   :  { %672 = vmatmul.bf16.gmra.mxu1 %v535_v3 }
 0x1a4   :  { %v697_v12 = vpop.f32.mrf.mxu2 }
 0x1ac   :  { %v699_v13 = vpop.f32.mrf.mxu2 }
 0x1b4   :  { %v702_v16 = vpop.f32.mrf.mxu2 }
 0x1bc   :  { %v704_v45 = vpop.f32.mrf.mxu2 }
 0x1ec   :  { %v658_v6 = vpop.f32.mrf.mxu1 }
 0x1ed   :  { %v659_v18 = vadd.f32 %v1133_v15, %v658_v6  ;;  %v1116_v6 = vld [vmem:[%s1554_s6 + $0x44] sm:$0xf0] }
 0x1ef   :  { %v1419_v25 = vadd.f32 %v687_v4, %v659_v18  ;;  %v1050_v4 = vld [vmem:[%s1554_s6 + $0x40] sm:$0xf]  ;;  %v1042_v18 = vld [vmem:[%s1554_s6 + $0x30] sm:$0xf] }
 0x1f1   :  { %v707_v46 = vmax.f32 %v1419_v25, 0.0  ;;  %v1108_v25 = vld [vmem:[%s1554_s6 + $0x4] sm:$0xf0] }
 0x1f3   :  { %v715_v63 = vrot.slane %v707_v46, 1 }
 0x1f4   :  { %v660_v8 = vpop.f32.mrf.mxu1 }
 0x1f5   :  { %v661_v51 = vadd.f32 %v1133_v15, %v660_v8  ;;  %v1055_v8 = vor.u32 %v1115_v61, %v1052_v62 }
 0x1f7   :  { %v690_v1 = vadd.f32 %v1408_v5, %v661_v51  ;;  %879 = vmatpush.bf16.msrb.mxu2 %v1055_v8 }
 0x1fc   :  { %v663_v9 = vpop.f32.mrf.mxu1 }
 0x1fd   :  { %v664_v32 = vadd.f32 %v1133_v15, %v663_v9 }
 0x1ff   :  { %v693_v56 = vadd.f32 %v692_v7, %v664_v32  ;;  %v1034_v32 = vld [vmem:[%s1554_s6 + $0x20] sm:$0xf] }
 0x201   :  { %v709_v7 = vmax.f32 %v693_v56, 0.0  ;;  %v1018_v56 = vld [vmem:[%s1554_s6] sm:$0xf] }
 0x203   :  { %v717_v39 = vrot.slane %v709_v7, 1 }
 0x204   :  { %v665_v11 = vpop.f32.mrf.mxu1 }
 0x205   :  { %v666_v31 = vadd.f32 %v1133_v15, %v665_v11 }
 0x207   :  { %v695_v47 = vadd.f32 %v694_v10, %v666_v31 }
 0x209   :  { %v710_v0 = vmax.f32 %v695_v47, 0.0  ;;  %v1110_v47 = vld [vmem:[%s1554_s6 + $0x14] sm:$0xf0] }
 0x20c   :  { %v668_v21 = vpop.f32.mrf.mxu1 }
 0x20d   :  { %v669_v23 = vadd.f32 %v1133_v15, %v668_v21  ;;  %v1044_v21 = vld [vmem:[%s1554_s6 + $0x38] sm:$0xf0] }
 0x20f   :  { %v1433_v34 = vadd.f32 %v697_v12, %v669_v23  ;;  %v1113_v12 = vld [vmem:[%s1554_s6 + $0x34] sm:$0xf] }
 0x210   :  { %v1047_v33 = vor.u32 %v1113_v12, %v1044_v21 }
 0x211   :  { %v711_v57 = vmax.f32 %v1433_v34, 0.0  ;;  %v1112_v34 = vld [vmem:[%s1554_s6 + $0x24] sm:$0xf0] }
 0x212   :  { %880 = vmatpush.bf16.msrb.mxu2 %v1047_v33  ;;  %v1035_v43 = vor.u32 %v1112_v34, %v1034_v32 }
 0x213   :  { %v719_v9 = vrot.slane %v711_v57, 1 }
 0x214   :  { %v670_v14 = vpop.f32.mrf.mxu1 }
 0x215   :  { %v671_v20 = vadd.f32 %v1133_v15, %v670_v14 }
 0x216   :  { %881 = vmatpush.bf16.msrb.mxu2 %v1039_v37 }
 0x217   :  { %v700_v28 = vadd.f32 %v699_v13, %v671_v20  ;;  %v1114_v20 = vld [vmem:[%s1554_s6 + $0x34] sm:$0xf0] }
 0x218   :  { %v1043_v27 = vor.u32 %v1114_v20, %v1042_v18 }
 0x219   :  { %v712_v52 = vmax.f32 %v700_v28, 0.0 }
 0x21b   :  { %v720_v2 = vrot.slane %v712_v52, 1 }
 0x21c   :  { %v673_v17 = vpop.f32.mrf.mxu1 }
 0x21d   :  { %v674_v22 = vadd.f32 %v1133_v15, %v673_v17  ;;  %v718_v17 = vrot.slane %v710_v0, 1 }
 0x21f   :  { %v703_v24 = vadd.f32 %v702_v16, %v674_v22  ;;  %v708_v16 = vmax.f32 %v690_v1, 0.0  ;;  %v725_v22 = vsel %vm422_vm2, %v719_v9, %v720_v2  ;;  %v726_v31 = vsel %vm422_vm2, %v718_v17, %v719_v9 }
 0x220   :  { %v735_v26 = vmax.f32 %v711_v57, %v725_v22  ;;  %v727_v30 = vsel %vm422_vm2, %v717_v39, %v718_v17  ;;  %v734_v36 = vmax.f32 %v710_v0, %v726_v31  ;;  %v1019_v57 = vor.u32 %v1108_v25, %v1018_v56 }
 0x221   :  { %v713_v41 = vmax.f32 %v703_v24, 0.0  ;;  %v716_v28 = vrot.slane %v708_v16, 1 }
 0x223   :  { %v721_v59 = vrot.slane %v713_v41, 1  ;;  %v728_v38 = vsel %vm422_vm2, %v716_v28, %v717_v39  ;;  %v729_v44 = vsel %vm422_vm2, %v715_v63, %v716_v28 }
 0x224   :  { %v675_v35 = vpop.f32.mrf.mxu1  ;;  %v732_v51 = vmax.f32 %v708_v16, %v728_v38 }
 0x225   :  { %v676_v42 = vadd.f32 %v1133_v15, %v675_v35  ;;  %v724_v11 = vsel %vm422_vm2, %v720_v2, %v721_v59  ;;  %v1051_v15 = vor.u32 %v1116_v6, %v1050_v4 }
 0x226   :  { %v736_v24 = vmax.f32 %v712_v52, %v724_v11 }
 0x227   :  { %v705_v53 = vadd.f32 %v704_v45, %v676_v42  ;;  %866 = vmatpush.bf16.msrb.mxu3 %v1051_v15  ;;  %v733_v42 = vmax.f32 %v709_v7, %v727_v30  ;;  %v1026_v45 = vld [vmem:[%s1554_s6 + $0x10] sm:$0xf] }
 0x228   :  { %v742_v35 = vpack.c.bf16 %v736_v24, %v735_v26  ;;  %v1027_v54 = vor.u32 %v1110_v47, %v1026_v45 }
 0x229   :  { %v714_v60 = vmax.f32 %v705_v53, 0.0  ;;  %v741_v50 = vpack.c.bf16 %v734_v36, %v733_v42  ;;  %v731_v53 = vmax.f32 %v707_v46, %v729_v44  ;;  %v1107_v46 = vld [vmem:[%s1554_s6 + $0x4] sm:$0xf] }
 0x22b   :  { %v722_v3 = vrot.slane %v714_v60, 1  ;;  %867 = vmatpush.bf16.msrb.mxu3 %v1043_v27  ;;  %v740_v29 = vpack.c.bf16 %v732_v51, %v731_v53 }
 0x22d   :  { %v723_v10 = vsel %vm422_vm2, %v721_v59, %v722_v3  ;;  %v730_v5 = vsel %vm422_vm2, %v722_v3, %v715_v63  ;;  %v1023_v59 = vor.u32 %v1107_v46, %v1020_v58  ;;  %v777_v63 = vld [vmem:[%s1556_s7] sm:$0x3] }
 0x22e   :  { %v737_v13 = vmax.f32 %v713_v41, %v723_v10  ;;  %v738_v14 = vmax.f32 %v714_v60, %v730_v5  ;;  %v1028_v41 = vld [vmem:[%s1554_s6 + $0x18] sm:$0xf0]  ;;  %v779_v0 = vperm.slane %v777_v63, 0  ;;  %v780_v19 = vperm.slane %v777_v63, 1 }
 0x22f   :  { %v1031_v52 = vor.u32 %v1109_v40, %v1028_v41  ;;  %868 = vmatpush.bf16.msrb.mxu3 %v1035_v43 }
 0x230   :  { %v743_v23 = vpack.c.bf16 %v738_v14, %v737_v13 }
 0x231   :  { %882 = vmatpush.bf16.msrb.mxu2 %v1031_v52 }
 0x232   :  { %751 = vmatpush.bf16.msrb.mxu1 %v743_v23 }
 0x233   :  { %869 = vmatpush.bf16.msrb.mxu3 %v1027_v54 }
 0x235   :  { %883 = vmatpush.bf16.msrb.mxu2 %v1023_v59 }
 0x236   :  { %752 = vmatpush.bf16.msrb.mxu1 %v742_v35 }
 0x237   :  { %870 = vmatpush.bf16.msrb.mxu3 %v1019_v57 }
 0x23a   :  { %753 = vmatpush.bf16.msrb.mxu1 %v741_v50 }
 0x23e   :  { %754 = vmatpush.bf16.msrb.mxu1 %v740_v29 }
 0x241   :  { %1015 = vmatmul.msk.bf16.vlgmr.msrb.gmra.mxu1 %vm455_vm6, %v739_v55 }
 0x2be   :  { %v756_v60 = vpop.f32.mrf.mxu1 }
 0x2bf   :  { %v760_v61 = vpack.c.bf16 %v756_v60, %v756_v60 }
 0x2c1   :  { %871 = vmatmul.bf16.vlgmr.msrb.gmra.mxu3 %v760_v61  ;;  %884 = vmatmul.bf16.vlgmr.msrb.gmra.mxu2 %v760_v61 }
 0x2c6   :  { %v758_v62 = vpop.f32.mrf.mxu1 }
 0x344   :  { %v872_v1 = vpop.f32.mrf.mxu3  ;;  %v885_v2 = vpop.f32.mrf.mxu2 }
 0x345   :  { %v873_v3 = vadd.f32 %v872_v1, %v779_v0  ;;  %v886_v4 = vadd.f32 %v885_v2, %v780_v19 }
 0x347   :  { %889 = vst [vmem:[%s1557_s8] sm:$0xff] %v873_v3 }
 0x348   :  { %890 = vst [vmem:[%s1557_s8 + $0x8] sm:$0xff] %v886_v4 }
 0x34c   :  { %v874_v6 = vpop.f32.mrf.mxu3  ;;  %v887_v7 = vpop.f32.mrf.mxu2 }

</bundles_post_ra>
